<compile_context>
chip_gen: v7x
topology: tpu7x:2x2x1
jax: 0.10.0
libtpu: 0.0.40
codegen_flags: <defaults>
</compile_context>

<pallas_src>
import functools

import jax
import jax.numpy as jnp
from jax.experimental import pallas as pl
from jax.experimental.pallas import tpu as pltpu


def _round_up(n: int, m: int) -> int:
    return ((n + m - 1) // m) * m


def mlp_kernel(x_ref, w1_ref, b1_ref, w2_ref, b2_ref, w3_ref, b3_ref, o_ref):
    # x / weights are bf16 -> MXU runs at bf16 peak; accumulation is f32.
    x = x_ref[...]

    h1 = jnp.dot(x, w1_ref[...], preferred_element_type=jnp.float32) + b1_ref[...]
    h1 = jnp.maximum(h1, 0.0).astype(x.dtype)          # back to bf16 for next MXU op

    h2 = jnp.dot(h1, w2_ref[...], preferred_element_type=jnp.float32) + b2_ref[...]
    h2 = jnp.maximum(h2, 0.0).astype(x.dtype)

    out = jnp.dot(h2, w3_ref[...], preferred_element_type=jnp.float32) + b3_ref[...]
    o_ref[...] = out.astype(o_ref.dtype)               # lane-dense (padded) f32 store


def _pad2(a, rows, cols):
    return jnp.pad(a, ((0, rows - a.shape[0]), (0, cols - a.shape[1])))


@functools.partial(jax.jit, static_argnames=("block_batch", "compute_dtype"))
def mlp_forward(x, params, *, block_batch: int = 128, compute_dtype=jnp.bfloat16):
    """x: (B, in_dim) float32. params: dict w1,b1,w2,b2,w3,b3 (biases shaped (1, n))."""
    w1, b1, w2, b2, w3, b3 = (params[k] for k in ("w1", "b1", "w2", "b2", "w3", "b3"))
    B, in_dim = x.shape
    hid_dim = w1.shape[1]
    out_dim = w3.shape[1]

    # Lane-dense padded feature dims (multiples of 128); batch padded to the tile.
    in_p = _round_up(in_dim, 128)
    hid_p = _round_up(hid_dim, 128)
    out_p = _round_up(out_dim, 128)
    tm = min(block_batch, _round_up(B, 8))
    B_p = _round_up(B, tm)

    # Zero-padding is exact: padded hidden cols get w=0,b=0 -> ReLU(0)=0, and the
    # matching padded fan_in rows of the next weight are 0, so real outputs are
    # unchanged; padded output cols are identically 0 and sliced off below.
    xp = _pad2(x, B_p, in_p).astype(compute_dtype)
    w1p = _pad2(w1, in_p, hid_p).astype(compute_dtype)
    w2p = _pad2(w2, hid_p, hid_p).astype(compute_dtype)
    w3p = _pad2(w3, hid_p, out_p).astype(compute_dtype)
    b1p = _pad2(b1, 1, hid_p).astype(jnp.float32)       # bias add stays f32
    b2p = _pad2(b2, 1, hid_p).astype(jnp.float32)
    b3p = _pad2(b3, 1, out_p).astype(jnp.float32)

    n_blocks = B_p // tm
    resident = lambda shape: pl.BlockSpec(shape, lambda i: (0, 0))  # weight/bias: stay in VMEM

    flops = 2 * B_p * (in_p * hid_p + hid_p * hid_p + hid_p * out_p)
    bytes_accessed = sum(
        a.size * a.dtype.itemsize for a in (xp, w1p, b1p, w2p, b2p, w3p, b3p)
    ) + B_p * out_p * 4

    out_padded = pl.pallas_call(
        mlp_kernel,
        out_shape=jax.ShapeDtypeStruct((B_p, out_p), jnp.float32),
        grid=(n_blocks,),
        in_specs=[
            pl.BlockSpec((tm, in_p), lambda i: (i, 0)),   # per-step activation tile
            resident(w1p.shape), resident(b1p.shape),
            resident(w2p.shape), resident(b2p.shape),
            resident(w3p.shape), resident(b3p.shape),
        ],
        out_specs=pl.BlockSpec((tm, out_p), lambda i: (i, 0)),
        compiler_params=pltpu.CompilerParams(
            dimension_semantics=("parallel",),            # batch axis across TCs (v7x)
        ),
        cost_estimate=pl.CostEstimate(
            flops=flops, transcendentals=0, bytes_accessed=bytes_accessed
        ),
    )(xp, w1p, b1p, w2p, b2p, w3p, b3p)

    return out_padded[:B, :out_dim].astype(x.dtype)


def init_params(key, in_dim, hidden_dim, out_dim):
    """Deterministic init mimicking PyTorch nn.Linear (uniform +/- 1/sqrt(fan_in))."""
    ks = jax.random.split(key, 6)

    def linear(kw, kb, fan_in, fan_out):
        bound = 1.0 / jnp.sqrt(fan_in)
        w = jax.random.uniform(kw, (fan_in, fan_out), jnp.float32, -bound, bound)
        b = jax.random.uniform(kb, (1, fan_out), jnp.float32, -bound, bound)
        return w, b

    w1, b1 = linear(ks[0], ks[1], in_dim, hidden_dim)
    w2, b2 = linear(ks[2], ks[3], hidden_dim, hidden_dim)
    w3, b3 = linear(ks[4], ks[5], hidden_dim, out_dim)
    return {"w1": w1, "b1": b1, "w2": w2, "b2": b2, "w3": w3, "b3": b3}


if __name__ == "__main__":
    # TODO(synk): at these DQN-sized toy shapes the call is launch-overhead bound;
    # the real win is batching many MLP evals per pallas_call / fusing upstream.
    in_dim, hidden_dim, out_dim = 16, 32, 4
    batch = 32

    key = jax.random.PRNGKey(0)
    k_params, k_x = jax.random.split(key)
    params = init_params(k_params, in_dim, hidden_dim, out_dim)
    x = jax.random.normal(k_x, (batch, in_dim), jnp.float32)

    out = jax.block_until_ready(mlp_forward(x, params, block_batch=8))
    assert out.shape == (batch, out_dim)

    # Reference with the same bf16 operands / f32 accumulation as the kernel.
    bf = jnp.bfloat16
    xb = x.astype(bf)
    h = jnp.maximum(
        jnp.dot(xb, params["w1"].astype(bf), preferred_element_type=jnp.float32)
        + params["b1"], 0.0).astype(bf)
    h = jnp.maximum(
        jnp.dot(h, params["w2"].astype(bf), preferred_element_type=jnp.float32)
        + params["b2"], 0.0).astype(bf)
    ref_bf16 = jnp.dot(h, params["w3"].astype(bf),
                       preferred_element_type=jnp.float32) + params["b3"]
    assert jnp.allclose(out, ref_bf16, atol=2e-2, rtol=2e-2)

    # Sanity vs. the full-f32 PyTorch-equivalent math (loose: bf16 operand rounding).
    hf = jnp.maximum(x @ params["w1"] + params["b1"], 0.0)
    hf = jnp.maximum(hf @ params["w2"] + params["b2"], 0.0)
    ref_f32 = hf @ params["w3"] + params["b3"]
    assert jnp.allclose(out, ref_f32, atol=5e-2, rtol=5e-2)

    print("KERNEL_OK")
</pallas_src>

<mosaic_0001>
module attributes {stable_mosaic.version = 11 : i64} {
  func.func @mlp_kernel(%arg0: i32, %arg1: memref<8x128xbf16, #tpu.memory_space<vmem>>, %arg2: memref<128x128xbf16, #tpu.memory_space<vmem>>, %arg3: memref<1x128xf32, #tpu.memory_space<vmem>>, %arg4: memref<128x128xbf16, #tpu.memory_space<vmem>>, %arg5: memref<1x128xf32, #tpu.memory_space<vmem>>, %arg6: memref<128x128xbf16, #tpu.memory_space<vmem>>, %arg7: memref<1x128xf32, #tpu.memory_space<vmem>>, %arg8: memref<8x128xf32, #tpu.memory_space<vmem>>) attributes {dimension_semantics = [#tpu.dimension_semantics<parallel>], iteration_bounds = array<i64: 4>, scalar_prefetch = 0 : i64, scratch_operands = 0 : i64, tpu.core_type = #tpu.core_type<tc>, window_params = [{transform_indices = @transform_0, window_bounds = array<i64: 8, 128>}, {pipeline_mode = #tpu.pipeline_mode<synchronous>, transform_indices = @transform_1, window_bounds = array<i64: 128, 128>}, {pipeline_mode = #tpu.pipeline_mode<synchronous>, transform_indices = @transform_2, window_bounds = array<i64: 1, 128>}, {pipeline_mode = #tpu.pipeline_mode<synchronous>, transform_indices = @transform_3, window_bounds = array<i64: 128, 128>}, {pipeline_mode = #tpu.pipeline_mode<synchronous>, transform_indices = @transform_4, window_bounds = array<i64: 1, 128>}, {pipeline_mode = #tpu.pipeline_mode<synchronous>, transform_indices = @transform_5, window_bounds = array<i64: 128, 128>}, {pipeline_mode = #tpu.pipeline_mode<synchronous>, transform_indices = @transform_6, window_bounds = array<i64: 1, 128>}, {transform_indices = @transform_7, window_bounds = array<i64: 8, 128>}]} {
    %c0 = arith.constant 0 : index
    %c0_0 = arith.constant 0 : index
    %0 = vector.load %arg1[%c0, %c0_0] : memref<8x128xbf16, #tpu.memory_space<vmem>>, vector<8x128xbf16>
    %c0_1 = arith.constant 0 : index
    %c0_2 = arith.constant 0 : index
    %1 = vector.load %arg2[%c0_1, %c0_2] : memref<128x128xbf16, #tpu.memory_space<vmem>>, vector<128x128xbf16>
    %cst = arith.constant dense<0.000000e+00> : vector<8x128xf32>
    %2 = tpu.matmul %0, %1, %cst {dimension_numbers = #tpu.dot_dimension_numbers<[1], [0], [0], [1], [0, 0, 1, 1], [], []>} : vector<8x128xbf16>, vector<128x128xbf16>, vector<8x128xf32> -> vector<8x128xf32>
    %c0_3 = arith.constant 0 : index
    %c0_4 = arith.constant 0 : index
    %3 = vector.load %arg3[%c0_3, %c0_4] : memref<1x128xf32, #tpu.memory_space<vmem>>, vector<1x128xf32>
    %4 = vector.broadcast %3 : vector<1x128xf32> to vector<8x128xf32>
    %5 = arith.addf %2, %4 : vector<8x128xf32>
    %cst_5 = arith.constant 0.000000e+00 : f32
    %6 = vector.broadcast %cst_5 : f32 to vector<8x128xf32>
    %7 = arith.maximumf %5, %6 : vector<8x128xf32>
    %8 = arith.truncf %7 : vector<8x128xf32> to vector<8x128xbf16>
    %c0_6 = arith.constant 0 : index
    %c0_7 = arith.constant 0 : index
    %9 = vector.load %arg4[%c0_6, %c0_7] : memref<128x128xbf16, #tpu.memory_space<vmem>>, vector<128x128xbf16>
    %cst_8 = arith.constant dense<0.000000e+00> : vector<8x128xf32>
    %10 = tpu.matmul %8, %9, %cst_8 {dimension_numbers = #tpu.dot_dimension_numbers<[1], [0], [0], [1], [0, 0, 1, 1], [], []>} : vector<8x128xbf16>, vector<128x128xbf16>, vector<8x128xf32> -> vector<8x128xf32>
    %c0_9 = arith.constant 0 : index
    %c0_10 = arith.constant 0 : index
    %11 = vector.load %arg5[%c0_9, %c0_10] : memref<1x128xf32, #tpu.memory_space<vmem>>, vector<1x128xf32>
    %12 = vector.broadcast %11 : vector<1x128xf32> to vector<8x128xf32>
    %13 = arith.addf %10, %12 : vector<8x128xf32>
    %cst_11 = arith.constant 0.000000e+00 : f32
    %14 = vector.broadcast %cst_11 : f32 to vector<8x128xf32>
    %15 = arith.maximumf %13, %14 : vector<8x128xf32>
    %16 = arith.truncf %15 : vector<8x128xf32> to vector<8x128xbf16>
    %c0_12 = arith.constant 0 : index
    %c0_13 = arith.constant 0 : index
    %17 = vector.load %arg6[%c0_12, %c0_13] : memref<128x128xbf16, #tpu.memory_space<vmem>>, vector<128x128xbf16>
    %cst_14 = arith.constant dense<0.000000e+00> : vector<8x128xf32>
    %18 = tpu.matmul %16, %17, %cst_14 {dimension_numbers = #tpu.dot_dimension_numbers<[1], [0], [0], [1], [0, 0, 1, 1], [], []>} : vector<8x128xbf16>, vector<128x128xbf16>, vector<8x128xf32> -> vector<8x128xf32>
    %c0_15 = arith.constant 0 : index
    %c0_16 = arith.constant 0 : index
    %19 = vector.load %arg7[%c0_15, %c0_16] : memref<1x128xf32, #tpu.memory_space<vmem>>, vector<1x128xf32>
    %20 = vector.broadcast %19 : vector<1x128xf32> to vector<8x128xf32>
    %21 = arith.addf %18, %20 : vector<8x128xf32>
    %c0_17 = arith.constant 0 : index
    %c0_18 = arith.constant 0 : index
    %22 = vector.load %arg8[%c0_17, %c0_18] : memref<8x128xf32, #tpu.memory_space<vmem>>, vector<8x128xf32>
    tpu.vector_store %arg8[%c0_17, %c0_18], %21 {strides = array<i32>} : memref<8x128xf32, #tpu.memory_space<vmem>>, vector<8x128xf32>,
    return
  }
  func.func @transform_0(%arg0: i32) -> (i32, i32) {
    %c0_i32 = arith.constant 0 : i32
    %c0_i32_0 = arith.constant 0 : i32
    return %arg0, %c0_i32 : i32, i32
  }
  func.func @transform_1(%arg0: i32) -> (i32, i32) {
    %c0_i32 = arith.constant 0 : i32
    %c0_i32_0 = arith.constant 0 : i32
    %c0_i32_1 = arith.constant 0 : i32
    return %c0_i32, %c0_i32_0 : i32, i32
  }
  func.func @transform_2(%arg0: i32) -> (i32, i32) {
    %c0_i32 = arith.constant 0 : i32
    %c0_i32_0 = arith.constant 0 : i32
    %c0_i32_1 = arith.constant 0 : i32
    return %c0_i32, %c0_i32_0 : i32, i32
  }
  func.func @transform_3(%arg0: i32) -> (i32, i32) {
    %c0_i32 = arith.constant 0 : i32
    %c0_i32_0 = arith.constant 0 : i32
    %c0_i32_1 = arith.constant 0 : i32
    return %c0_i32, %c0_i32_0 : i32, i32
  }
  func.func @transform_4(%arg0: i32) -> (i32, i32) {
    %c0_i32 = arith.constant 0 : i32
    %c0_i32_0 = arith.constant 0 : i32
    %c0_i32_1 = arith.constant 0 : i32
    return %c0_i32, %c0_i32_0 : i32, i32
  }
  func.func @transform_5(%arg0: i32) -> (i32, i32) {
    %c0_i32 = arith.constant 0 : i32
    %c0_i32_0 = arith.constant 0 : i32
    %c0_i32_1 = arith.constant 0 : i32
    return %c0_i32, %c0_i32_0 : i32, i32
  }
  func.func @transform_6(%arg0: i32) -> (i32, i32) {
    %c0_i32 = arith.constant 0 : i32
    %c0_i32_0 = arith.constant 0 : i32
    %c0_i32_1 = arith.constant 0 : i32
    return %c0_i32, %c0_i32_0 : i32, i32
  }
  func.func @transform_7(%arg0: i32) -> (i32, i32) {
    %c0_i32 = arith.constant 0 : i32
    %c0_i32_0 = arith.constant 0 : i32
    return %arg0, %c0_i32 : i32, i32
  }
}

</mosaic_0001>

<bundles_post_ra>
// kernel: mlp_forward.1
= control target key start
LH: loop header
LB: loop body
LE: loop exit
PB: predicated region body
PF: predicated region fallthrough
CT: control target
= control target key end

     0   :  { %s874_s24 = smov 0   ;;  %s1006_s0 = inlined_call_operand.vmem [shape: bf16[32,128], index: 0, kind: input, shape index: {}]   ;;  %s1007_s1 = inlined_call_operand.vmem [shape: bf16[128,128], index: 1, kind: input, shape index: {}]   ;;  %s1008_s2 = inlined_call_operand.vmem [shape: f32[1,128], index: 2, kind: input, shape index: {}]   ;;  %s1009_s3 = inlined_call_operand.vmem [shape: bf16[128,128], index: 3, kind: input, shape index: {}]   ;;  %s1010_s4 = inlined_call_operand.vmem [shape: f32[1,128], index: 4, kind: input, shape index: {}]   ;;  %s1011_s5 = inlined_call_operand.vmem [shape: bf16[128,128], index: 5, kind: input, shape index: {}]   ;;  %s1012_s6 = inlined_call_operand.vmem [shape: f32[1,128], index: 6, kind: input, shape index: {}]   ;;  %s1013_s7 = inlined_call_operand.vmem [shape: f32[32,128], index: 7, kind: output, shape index: {}]  }
   0x1 LB: > { %s667_s25 = sadd.s32 4294967295, %s830_s24   ;;  %p671_p0 = scmp.ge.s32.totalorder %s830_s24, 1  ;;  %s830_s24 = sphi %s874_s24, %s17_s24  }
   0x2   : > { %p236_p1 = scmp.lt.s32.totalorder %s830_s24, 5 }
   0x4   : > { %p237_p2 = pnand %p671_p0, %p236_p1 }
   0x5   : > { %v800_v0 = vld [vmem:[%s1007_s1] sm:$0xff] (!%p237_p2)   ;;  %v832_v1 = vmov (!%p237_p2), 0.0   ;;  %v801_v2 = vld [vmem:[%s1007_s1 + $0x8] sm:$0xff] (!%p237_p2)   ;;  %vm833_vm0 = vmmov (!%p237_p2), 0   ;;  %v802_v3 = vld [vmem:[%s1007_s1 + $0x10] sm:$0xff] (!%p237_p2)   ;;  %p266_p3 = scmp.lt.s32.totalorder (!%p237_p2), %s667_s25, 3 }
   0x6   : > { %240 = sbr.rel (%p237_p2) target bundleno = 689 (0x2b1), region = 48  ;;  %730 = vmatprep.subr.bf16.mxu0 (!%p237_p2), %v832_v1  ;;  %750 = vmatprep.subr.bf16.mxu1 (!%p237_p2), %v832_v1  ;;  %v808_v4 = vld [vmem:[%s1009_s3] sm:$0xff] (!%p237_p2)   ;;  %v803_v5 = vld [vmem:[%s1007_s1 + $0x18] sm:$0xff] (!%p237_p2)   ;;  %v809_v6 = vld [vmem:[%s1009_s3 + $0x8] sm:$0xff] (!%p237_p2)  }
   0x7   : > { %731 = vmatpush3.bf16.msra.mxu0 (!%p237_p2), %v800_v0  ;;  %746 = vmatprep.mubr.msk.bf16.mxu0 (!%p237_p2), %vm833_vm0, %v832_v1  ;;  %v804_v7 = vld [vmem:[%s1007_s1 + $0x20] sm:$0xff] (!%p237_p2)   ;;  %v810_v8 = vld [vmem:[%s1009_s3 + $0x10] sm:$0xff] (!%p237_p2)   ;;  %v805_v9 = vld [vmem:[%s1007_s1 + $0x28] sm:$0xff] (!%p237_p2)  }
   0x8   : > { %732 = vmatprep.subr.bf16.mxu0 (!%p237_p2), %v832_v1  ;;  %766 = vmatprep.mubr.msk.bf16.mxu1 (!%p237_p2), %vm833_vm0, %v832_v1  ;;  %v811_v10 = vld [vmem:[%s1009_s3 + $0x18] sm:$0xff] (!%p237_p2)   ;;  %v806_v11 = vld [vmem:[%s1007_s1 + $0x30] sm:$0xff] (!%p237_p2)   ;;  %v812_v12 = vld [vmem:[%s1009_s3 + $0x20] sm:$0xff] (!%p237_p2)  }
   0x9   : > { %751 = vmatpush3.bf16.msra.mxu1 (!%p237_p2), %v808_v4  ;;  %v807_v13 = vld [vmem:[%s1007_s1 + $0x38] sm:$0xff] (!%p237_p2)   ;;  %v813_v14 = vld [vmem:[%s1009_s3 + $0x28] sm:$0xff] (!%p237_p2)   ;;  %v814_v16 = vld [vmem:[%s1009_s3 + $0x30] sm:$0xff] (!%p237_p2)  }
   0xa   : > { %752 = vmatprep.subr.bf16.mxu1 (!%p237_p2), %v832_v1  ;;  %v815_v17 = vld [vmem:[%s1009_s3 + $0x38] sm:$0xff] (!%p237_p2)   ;;  %v816_v18 = vld [vmem:[%s1011_s5] sm:$0xff] (!%p237_p2)   ;;  %v817_v19 = vld [vmem:[%s1011_s5 + $0x8] sm:$0xff] (!%p237_p2)  }
   0xb   : > { %733 = vmatpush3.bf16.msra.mxu0 (!%p237_p2), %v801_v2  ;;  %v818_v20 = vld [vmem:[%s1011_s5 + $0x10] sm:$0xff] (!%p237_p2)   ;;  %v819_v21 = vld [vmem:[%s1011_s5 + $0x18] sm:$0xff] (!%p237_p2)   ;;  %v820_v22 = vld [vmem:[%s1011_s5 + $0x20] sm:$0xff] (!%p237_p2)  }
   0xc   : > { %734 = vmatprep.subr.bf16.mxu0 (!%p237_p2), %v832_v1  ;;  %v821_v23 = vld [vmem:[%s1011_s5 + $0x28] sm:$0xff] (!%p237_p2)   ;;  %v674_v24 = vld [vmem:[%s1008_s2] ss:$0 sm:$0xff] (!%p237_p2)  ;;  %v822_v32 = vld [vmem:[%s1011_s5 + $0x30] sm:$0xff] (!%p237_p2)  }
   0xd   : > { %s1015_s25 = smov (!%p266_p3, %s667_s25), 3  ;;  %753 = vmatpush3.bf16.msra.mxu1 %v809_v6  ;;  %v823_v33 = vld [vmem:[%s1011_s5 + $0x38] sm:$0xff]   ;;  %v683_v34 = vld [vmem:[%s1010_s4] ss:$0 sm:$0xff] }
   0xe   : > { %754 = vmatprep.subr.bf16.mxu1 %v832_v1  ;;  %s672_s29 = sshll.u32 %s1015_s25, 2  ;;  %s673_s17 = sshll.u32 %s1015_s25, 3  ;;  %v692_v42 = vld [vmem:[%s1012_s6] ss:$0 sm:$0xff] }
   0xf   : > { %735 = vmatpush3.bf16.msra.mxu0 %v802_v3  ;;  %s269_s11 = scalar_lea.vmem %s1006_s0, %s672_s29  ;;  %s273_s22 = scalar_lea.vmem %s1013_s7, %s673_s17 }
  0x10   : > { %736 = vmatprep.subr.bf16.mxu0 %v832_v1  ;;  %v275_v15 = vld [vmem:[%s269_s11] sm:$0xf] }
  0x11   : > { %755 = vmatpush3.bf16.msra.mxu1 %v810_v8 }
  0x12   : > { %756 = vmatprep.subr.bf16.mxu1 %v832_v1 }
  0x13   : > { %737 = vmatpush3.bf16.msra.mxu0 %v803_v5 }
  0x14   : > { %738 = vmatprep.subr.bf16.mxu0 %v832_v1 }
  0x15   : > { %757 = vmatpush3.bf16.msra.mxu1 %v811_v10 }
  0x16   : > { %758 = vmatprep.subr.bf16.mxu1 %v832_v1 }
  0x17   : > { %739 = vmatpush3.bf16.msra.mxu0 %v804_v7 }
  0x18   : > { %740 = vmatprep.subr.bf16.mxu0 %v832_v1 }
  0x19   : > { %759 = vmatpush3.bf16.msra.mxu1 %v812_v12 }
  0x1a   : > { %760 = vmatprep.subr.bf16.mxu1 %v832_v1 }
  0x1b   : > { %741 = vmatpush3.bf16.msra.mxu0 %v805_v9 }
  0x1c   : > { %742 = vmatprep.subr.bf16.mxu0 %v832_v1 }
  0x1d   : > { %761 = vmatpush3.bf16.msra.mxu1 %v813_v14 }
  0x1e   : > { %762 = vmatprep.subr.bf16.mxu1 %v832_v1 }
  0x1f   : > { %743 = vmatpush3.bf16.msra.mxu0 %v806_v11 }
  0x20   : > { %744 = vmatprep.subr.bf16.mxu0 %v832_v1 }
  0x21   : > { %763 = vmatpush3.bf16.msra.mxu1 %v814_v16 }
  0x22   : > { %764 = vmatprep.subr.bf16.mxu1 %v832_v1 }
  0x23   : > { %745 = vmatpush3.bf16.msra.mxu0 %v807_v13 }
  0x24   : > { %770 = vmatprep.subr.bf16.mxu0 %v832_v1 }
  0x25   : > { %765 = vmatpush3.bf16.msra.mxu1 %v815_v17 }
  0x26   : > { %747 = vmatmul.mubr.bf16.vlgmr.msra.gmra.mrb[0].mxu0 %v275_v15 }
  0x27   : > { %786 = vmatprep.mubr.msk.bf16.mxu0 %vm833_vm0, %v832_v1  ;;  %771 = vmatpush3.bf16.msra.mxu0 %v816_v18 }
  0x28   : > { %772 = vmatprep.subr.bf16.mxu0 %v832_v1 }
  0x2b   : > { %773 = vmatpush3.bf16.msra.mxu0 %v817_v19 }
  0x2c   : > { %774 = vmatprep.subr.bf16.mxu0 %v832_v1 }
  0x2f   : > { %775 = vmatpush3.bf16.msra.mxu0 %v818_v20 }
  0x30   : > { %776 = vmatprep.subr.bf16.mxu0 %v832_v1 }
  0x33   : > { %777 = vmatpush3.bf16.msra.mxu0 %v819_v21 }
  0x34   : > { %778 = vmatprep.subr.bf16.mxu0 %v832_v1 }
  0x37   : > { %779 = vmatpush3.bf16.msra.mxu0 %v820_v22 }
  0x38   : > { %780 = vmatprep.subr.bf16.mxu0 %v832_v1 }
  0x3b   : > { %781 = vmatpush3.bf16.msra.mxu0 %v821_v23 }
  0x3c   : > { %782 = vmatprep.subr.bf16.mxu0 %v832_v1 }
  0x3f   : > { %783 = vmatpush3.bf16.msra.mxu0 %v822_v32 }
  0x40   : > { %784 = vmatprep.subr.bf16.mxu0 %v832_v1 }
  0x43   : > { %785 = vmatpush3.bf16.msra.mxu0 %v823_v33 }
  0xf9   : > { %v381_v25 = vpop.f32.mrb[0].mxu0 }
  0xfa   : > { %v382_v26 = vadd.f32 %v674_v24, %v381_v25  ;;  %v748_v27 = vpop.f32.mrb[1].mxu0 }
  0xfb   : > { %v384_v28 = vpop.f32.mrb[2].mxu0 }
  0xfc   : > { %v387_v29 = vmax.f32 %v382_v26, 0.0  ;;  %v749_v30 = vpop.f32.mrb[3].mxu0 }
  0xfe   : > { %v388_v31 = vpack.c.bf16 %v387_v29, %v387_v29 }
 0x100   : > { %767 = vmatmul.mubr.bf16.vlgmr.msra.gmra.mrb[0].mxu1 %v388_v31 }
 0x1d3   : > { %v494_v35 = vpop.f32.mrb[0].mxu1 }
 0x1d4   : > { %v495_v36 = vadd.f32 %v683_v34, %v494_v35  ;;  %v768_v37 = vpop.f32.mrb[1].mxu1 }
 0x1d5   : > { %v497_v38 = vpop.f32.mrb[2].mxu1 }
 0x1d6   : > { %v500_v39 = vmax.f32 %v495_v36, 0.0  ;;  %v769_v40 = vpop.f32.mrb[3].mxu1 }
 0x1d8   : > { %v501_v41 = vpack.c.bf16 %v500_v39, %v500_v39 }
 0x1da   : > { %787 = vmatmul.mubr.bf16.vlgmr.msra.gmra.mrb[4].mxu0 %v501_v41 }
 0x2ad   : > { %v607_v43 = vpop.f32.mrb[4].mxu0 }
 0x2ae   : > { %v608_v44 = vadd.f32 %v692_v42, %v607_v43  ;;  %v788_v45 = vpop.f32.mrb[5].mxu0 }
 0x2af   : > { %v610_v46 = vpop.f32.mrb[6].mxu0 }
 0x2b0   : > { %613 = vst [vmem:[%s273_s22] sm:$0xff] %v608_v44  ;;  %v789_v47 = vpop.f32.mrb[7].mxu0 }
 0x2b1 PF: > { %s17_s24 = sadd.s32 1, %s830_s24  }
 0x2b2   : > { %p14_p4 = scmp.ge.s32.totalorder %s17_s24, 6  }
 0x2b4   :  { %16 = sbr.rel (!%p14_p4) target bundleno = 1 (0x1), region = 78 }

</bundles_post_ra>
